<compile_context>
chip_gen: v5e
topology: v5e:2x2
jax: 0.10.0
libtpu: 0.0.40
codegen_flags: <defaults>
</compile_context>

<pallas_src>
import math
from functools import partial

import jax
import jax.numpy as jnp
from jax import lax
from jax.experimental import pallas as pl
from jax.experimental.pallas import tpu as pltpu

_LANE = 128      # vreg lane width (last dim)
_SUBLANE = 8     # f32 sublane count (second-to-last dim)


def _round_up(x, m):
    return ((x + m - 1) // m) * m


def _gelu(x, approximate):
    if approximate:
        # tanh form: transcendentals go to the EUP slot (effectively free when MXU-bound).
        return jax.nn.gelu(x, approximate=True)
    # erf form: matches torch.nn.functional.gelu default (approximate='none').
    return 0.5 * x * (1.0 + lax.erf(x * (1.0 / math.sqrt(2.0))))


# ----------------------------- kernels -----------------------------

def _mlp_kernel_resident(x_ref, w1_ref, b1_ref, w2_ref, b2_ref, o_ref, *, approximate_gelu):
    # Whole fc1/fc2 weights resident in VMEM; one token tile per grid step.
    x = x_ref[...].astype(w1_ref.dtype)                               # in-kernel cast (VPU)
    h = jnp.dot(x, w1_ref[...], preferred_element_type=jnp.float32)   # (tm, Mp) f32 acc
    h = h + b1_ref[...]                                               # f32 bias (1, Mp)
    h = _gelu(h, approximate_gelu)
    # TODO(synk): dropout omitted (inference identity); add pltpu PRNG mask for training.
    o = jnp.dot(h.astype(w2_ref.dtype), w2_ref[...],
                preferred_element_type=jnp.float32)                   # (tm, Hp) f32 acc
    o_ref[...] = (o + b2_ref[...]).astype(o_ref.dtype)


def _mlp_kernel_mtiled(x_ref, w1_ref, b1_ref, w2_ref, b2_ref, o_ref, acc_ref, *,
                       approximate_gelu):
    # Weights tiled along the mlp dim (M); f32 accumulator carried across the M axis.
    j = pl.program_id(1)

    @pl.when(j == 0)
    def _():
        acc_ref[...] = jnp.zeros_like(acc_ref)

    x = x_ref[...].astype(w1_ref.dtype)
    h = jnp.dot(x, w1_ref[...], preferred_element_type=jnp.float32)   # (tm, tn)
    h = h + b1_ref[...]
    h = _gelu(h, approximate_gelu)
    acc_ref[...] += jnp.dot(h.astype(w2_ref.dtype), w2_ref[...],
                            preferred_element_type=jnp.float32)       # (tm, Hp)

    @pl.when(j == pl.num_programs(1) - 1)
    def _():
        o_ref[...] = (acc_ref[...] + b2_ref[...]).astype(o_ref.dtype)


# ------------------------ device / budget helpers ------------------------

def _device_kind():
    try:
        return jax.devices()[0].device_kind.lower()
    except Exception:
        return ""


def _is_v7(kind):
    return "v7" in kind


def _is_v5e(kind):
    return "v5e" in kind or "v5 lite" in kind or "v5lite" in kind


def _default_tm(kind):
    if _is_v7(kind) or _is_v5e(kind):
        return 256
    return 512   # v6e (and default): 128 MiB VMEM -> amortize ~0.35us per-step overhead


def _vmem_capacity_bytes(kind):
    try:
        cap = int(pltpu.get_tpu_info().vmem_capacity_bytes)
        if cap > 0:
            return cap
    except Exception:
        pass
    return (64 << 20) if _is_v7(kind) else (128 << 20)


def _vmem_budget_cap(kind):
    cap = _vmem_capacity_bytes(kind)
    # Leave headroom for compiler-internal scratch:
    # ~52 MiB usable on 64 MiB parts (v7x per-TC), ~112 MiB on 128 MiB parts (v5e/v6e).
    return cap - max(12 << 20, cap // 8)


def _with_headroom(need_bytes):
    return int(need_bytes * 1.15) + (2 << 20)


def _resident_vmem_bytes(tm, Hp, Mp, w_itemsize, x_itemsize, out_itemsize, weight_buffers):
    w = weight_buffers * (Hp * Mp + Mp * Hp) * w_itemsize
    b = weight_buffers * (Mp + Hp) * 4
    io = 2 * tm * Hp * x_itemsize + 2 * tm * Hp * out_itemsize   # double-buffered tiles
    tmp = tm * (Mp + Hp) * 4                                     # f32 intermediates
    return w + b + io + tmp


def _mtiled_vmem_bytes(tm, tn, Hp, w_itemsize, x_itemsize, out_itemsize):
    w = 2 * (Hp * tn + tn * Hp) * w_itemsize                     # double-buffered weight slabs
    b = 2 * (tn + Hp) * 4
    io = 2 * tm * Hp * x_itemsize + 2 * tm * Hp * out_itemsize
    acc = tm * Hp * 4
    tmp = tm * tn * 4
    return w + b + io + acc + tmp


# ------------------------ Buffered(1) capability probe ------------------------

_BUFFERED1_OK = None


def _probe_copy_kernel(x_ref, o_ref):
    o_ref[...] = x_ref[...]


def _buffered1_supported():
    """Narrow, one-time check that pipeline_mode=pl.Buffered(1) compiles & runs.
    Only this tiny probe is wrapped in try/except; the real kernel call never is."""
    global _BUFFERED1_OK
    if _BUFFERED1_OK is None:
        try:
            spec = pl.BlockSpec((_SUBLANE, _LANE), lambda i: (0, 0),
                                pipeline_mode=pl.Buffered(1))
            call = pl.pallas_call(
                _probe_copy_kernel,
                out_shape=jax.ShapeDtypeStruct((2 * _SUBLANE, _LANE), jnp.float32),
                grid_spec=pltpu.PrefetchScalarGridSpec(
                    num_scalar_prefetch=0,
                    grid=(2,),
                    in_specs=[spec],
                    out_specs=pl.BlockSpec((_SUBLANE, _LANE), lambda i: (i, 0)),
                ),
            )
            jax.block_until_ready(call(jnp.zeros((2 * _SUBLANE, _LANE), jnp.float32)))
            _BUFFERED1_OK = True
        except Exception:
            _BUFFERED1_OK = False
    return _BUFFERED1_OK


# ------------------------------ call builders ------------------------------

def _build_resident_call(T, Hp, Mp, tm, out_dtype, vmem_bytes, *, single_buffer_weights,
                         approximate_gelu):
    if single_buffer_weights:
        def const_spec(shape):
            return pl.BlockSpec(shape, lambda i: (0, 0), pipeline_mode=pl.Buffered(1))
    else:
        # Constant index_map: Pallas still fetches these blocks only once; the fallback
        # only costs 2x weight VMEM, which the dispatcher's budget already accounts for.
        def const_spec(shape):
            return pl.BlockSpec(shape, lambda i: (0, 0))

    return pl.pallas_call(
        partial(_mlp_kernel_resident, approximate_gelu=approximate_gelu),
        out_shape=jax.ShapeDtypeStruct((T, Hp), out_dtype),
        grid_spec=pltpu.PrefetchScalarGridSpec(
            num_scalar_prefetch=0,
            grid=(pl.cdiv(T, tm),),
            in_specs=[
                pl.BlockSpec((tm, Hp), lambda i: (i, 0)),   # x token tile (double-buffered)
                const_spec((Hp, Mp)),                       # fc1 weight (resident)
                const_spec((1, Mp)),                        # fc1 bias (f32)
                const_spec((Mp, Hp)),                       # fc2 weight (resident)
                const_spec((1, Hp)),                        # fc2 bias (f32)
            ],
            out_specs=pl.BlockSpec((tm, Hp), lambda i: (i, 0)),
        ),
        compiler_params=pltpu.CompilerParams(
            dimension_semantics=("parallel",),
            vmem_limit_bytes=int(vmem_bytes),
        ),
    )


def _build_mtiled_call(T, Hp, Mp, tm, tn, out_dtype, vmem_bytes, *, approximate_gelu):
    return pl.pallas_call(
        partial(_mlp_kernel_mtiled, approximate_gelu=approximate_gelu),
        out_shape=jax.ShapeDtypeStruct((T, Hp), out_dtype),
        grid_spec=pltpu.PrefetchScalarGridSpec(
            num_scalar_prefetch=0,
            grid=(pl.cdiv(T, tm), Mp // tn),
            in_specs=[
                pl.BlockSpec((tm, Hp), lambda i, j: (i, 0)),   # x tile (constant across j)
                pl.BlockSpec((Hp, tn), lambda i, j: (0, j)),   # fc1 weight slab
                pl.BlockSpec((1, tn), lambda i, j: (0, j)),    # fc1 bias slab (f32)
                pl.BlockSpec((tn, Hp), lambda i, j: (j, 0)),   # fc2 weight slab
                pl.BlockSpec((1, Hp), lambda i, j: (0, 0)),    # fc2 bias (f32)
            ],
            out_specs=pl.BlockSpec((tm, Hp), lambda i, j: (i, 0)),
            scratch_shapes=[pltpu.VMEM((tm, Hp), jnp.float32)],
        ),
        compiler_params=pltpu.CompilerParams(
            dimension_semantics=("parallel", "arbitrary"),
            vmem_limit_bytes=int(vmem_bytes),
        ),
    )


# ------------------------------ public API ------------------------------

def prepare_mlp_params(w1, b1, w2, b2, *, compute_dtype=jnp.bfloat16):
    """One-time param prep: pad feature dims to lane multiples and cast weights to the
    MXU compute dtype. Hoist this out of the hot path; only x-side prep runs per call.
    Biases stay f32 (tiny, single-buffered; preserves 1e-6-scale bias precision)."""
    H, M = w1.shape
    Hp, Mp = _round_up(H, _LANE), _round_up(M, _LANE)
    w_dtype = w1.dtype if compute_dtype is None else compute_dtype
    w1p = w1.astype(w_dtype)
    w2p = w2.astype(w_dtype)
    if (Hp, Mp) != (H, M):
        w1p = jnp.pad(w1p, ((0, Hp - H), (0, Mp - M)))
        w2p = jnp.pad(w2p, ((0, Mp - M), (0, Hp - H)))
    b1p = jnp.pad(b1.astype(jnp.float32), (0, Mp - M)).reshape(1, Mp)
    b2p = jnp.pad(b2.astype(jnp.float32), (0, Hp - H)).reshape(1, Hp)
    return {"w1": w1p, "b1": b1p, "w2": w2p, "b2": b2p,
            "H": H, "M": M, "Hp": Hp, "Mp": Mp}


def _finish(out2d, B, S, H, Hp):
    if Hp != H:
        out2d = out2d[:, :H]
    return out2d.reshape(B, S, H)


def mlp_forward_prepared(x, params, *, tm=None, approximate_gelu=True, force_m_tiled=False):
    """x: (B, S, H). params: output of prepare_mlp_params(). Returns (B, S, H)."""
    B, S, H = x.shape
    assert H == params["H"], "hidden size mismatch vs prepared params"
    Hp, Mp = params["Hp"], params["Mp"]
    w1p, b1p, w2p, b2p = params["w1"], params["b1"], params["w2"], params["b2"]
    out_dtype = x.dtype

    T = B * S
    x2d = x.reshape(T, H)
    if Hp != H:
        # Rare: standard ViT hidden sizes (768/1024/1280) are already lane multiples.
        x2d = jnp.pad(x2d, ((0, 0), (0, Hp - H)))
    # No padding along T: grid = cdiv(T, tm) and Pallas masks the ragged final token
    # tile (each output row depends only on its own input row).

    kind = _device_kind()
    cap = _vmem_budget_cap(kind)

    tm0 = _default_tm(kind) if tm is None else tm
    tm_eff = max(_SUBLANE, min(_round_up(tm0, _SUBLANE), _round_up(T, _SUBLANE)))
    # v7x megacore: give both TensorCores work -> at least two token tiles when possible.
    if _is_v7(kind) and T > _SUBLANE and pl.cdiv(T, tm_eff) < 2:
        tm_eff = max(_SUBLANE, _round_up(pl.cdiv(T, 2), _SUBLANE))

    wi = w1p.dtype.itemsize
    xi = x2d.dtype.itemsize
    oi = jnp.dtype(out_dtype).itemsize
    single_buf = _buffered1_supported()
    wbuf = 1 if single_buf else 2

    # Prefer the resident-weight kernel (weights DMA'd once, pure MXU inner loop);
    # fall back to M-tiling when the resident footprint exceeds the per-core budget.
    if not force_m_tiled:
        cand = tm_eff
        while True:
            need = _resident_vmem_bytes(cand, Hp, Mp, wi, xi, oi, wbuf)
            if _with_headroom(need) <= cap:
                vmem = min(max(_with_headroom(need), 16 << 20), cap)
                call = _build_resident_call(T, Hp, Mp, cand, out_dtype, vmem,
                                            single_buffer_weights=single_buf,
                                            approximate_gelu=approximate_gelu)
                return _finish(call(x2d, w1p, b1p, w2p, b2p), B, S, H, Hp)
            if cand <= 64:
                break
            cand = max(64, cand // 2)

    # M-tiled path (e.g. big f32 weight sets vs v7x's 64 MiB per-TC VMEM).
    tn = 128
    for c in (512, 256, 128):
        if Mp % c == 0:
            tn = c
            break
    tm_mt = tm_eff
    while (_with_headroom(_mtiled_vmem_bytes(tm_mt, tn, Hp, wi, xi, oi)) > cap
           and (tn > 128 or tm_mt > 64)):
        if tn > 128:
            tn //= 2
        else:
            tm_mt = max(64, tm_mt // 2)
    need = _mtiled_vmem_bytes(tm_mt, tn, Hp, wi, xi, oi)
    vmem = min(max(_with_headroom(need), 16 << 20), cap)
    call = _build_mtiled_call(T, Hp, Mp, tm_mt, tn, out_dtype, vmem,
                              approximate_gelu=approximate_gelu)
    return _finish(call(x2d, w1p, b1p, w2p, b2p), B, S, H, Hp)


def mlp_forward(x, w1, b1, w2, b2, *, tm=None, compute_dtype=jnp.bfloat16,
                approximate_gelu=True, force_m_tiled=False):
    """Convenience wrapper. For repeated calls, hoist prepare_mlp_params() and call
    mlp_forward_prepared() directly so the weight pad/cast runs once.

    Defaults trade bit-parity for speed: bf16 MXU inputs (f32 accumulation) and tanh
    GeLU. Pass compute_dtype=None, approximate_gelu=False for erf/f32 parity with torch.
    """
    params = prepare_mlp_params(w1, b1, w2, b2, compute_dtype=compute_dtype)
    return mlp_forward_prepared(x, params, tm=tm, approximate_gelu=approximate_gelu,
                                force_m_tiled=force_m_tiled)


# ------------------------------ init / reference ------------------------------

def _xavier_uniform(key, fan_in, fan_out, dtype=jnp.float32):
    # torch.nn.init.xavier_uniform_ : U(-a, a), a = sqrt(6 / (fan_in + fan_out))
    a = math.sqrt(6.0 / (fan_in + fan_out))
    return jax.random.uniform(key, (fan_in, fan_out), dtype=dtype, minval=-a, maxval=a)


def init_mlp_params(key, hidden_size, mlp_dim, dtype=jnp.float32):
    k1, k2, k3, k4 = jax.random.split(key, 4)
    w1 = _xavier_uniform(k1, hidden_size, mlp_dim, dtype)   # (H, M) == torch fc1.weight^T
    b1 = 1e-6 * jax.random.normal(k2, (mlp_dim,), dtype)
    w2 = _xavier_uniform(k3, mlp_dim, hidden_size, dtype)   # (M, H) == torch fc2.weight^T
    b2 = 1e-6 * jax.random.normal(k4, (hidden_size,), dtype)
    return w1, b1, w2, b2


def mlp_reference(x, w1, b1, w2, b2):
    h = jnp.einsum("bsh,hm->bsm", x, w1) + b1
    h = _gelu(h, approximate=False)
    return jnp.einsum("bsm,mh->bsh", h, w2) + b2


if __name__ == "__main__":
    # Small config: batch=2, seq=8, hidden_size=32, mlp_dim=128
    B, S, H, M = 2, 8, 32, 128

    key = jax.random.PRNGKey(0)
    kx, kp = jax.random.split(key)
    x = jax.random.normal(kx, (B, S, H), dtype=jnp.float32)
    w1, b1, w2, b2 = init_mlp_params(kp, H, M)

    y_ref = mlp_reference(x, w1, b1, w2, b2)

    # Exact path: f32 MXU inputs + erf GeLU -> matches torch default numerics.
    y_exact = mlp_forward(x, w1, b1, w2, b2, compute_dtype=None, approximate_gelu=False)
    y_exact = jax.block_until_ready(y_exact)
    assert y_exact.shape == (B, S, H)
    assert jnp.allclose(y_exact, y_ref, atol=1e-5, rtol=1e-5), "f32/erf mismatch vs reference"

    # Default fast path: bf16 MXU inputs (f32 accumulation) + tanh GeLU.
    y_fast = jax.block_until_ready(mlp_forward(x, w1, b1, w2, b2))
    assert y_fast.shape == (B, S, H)
    assert jnp.allclose(y_fast, y_ref, atol=5e-2, rtol=5e-2), "bf16/tanh mismatch vs reference"

    # M-tiled path (used automatically when resident weights exceed the per-core VMEM
    # budget, e.g. big f32 MLPs on v7x); exercised explicitly here for coverage.
    y_mt = mlp_forward(x, w1, b1, w2, b2, compute_dtype=None, approximate_gelu=False,
                       force_m_tiled=True)
    y_mt = jax.block_until_ready(y_mt)
    assert jnp.allclose(y_mt, y_ref, atol=1e-5, rtol=1e-5), "M-tiled mismatch vs reference"

    print("KERNEL_OK")
</pallas_src>

<mosaic_0001>
module attributes {stable_mosaic.version = 11 : i64} {
  func.func @_probe_copy_kernel(%arg0: i32, %arg1: memref<8x128xf32, #tpu.memory_space<vmem>>, %arg2: memref<8x128xf32, #tpu.memory_space<vmem>>) attributes {dimension_semantics = [#tpu.dimension_semantics<arbitrary>], iteration_bounds = array<i64: 2>, scalar_prefetch = 0 : i64, scratch_operands = 0 : i64, tpu.core_type = #tpu.core_type<tc>, window_params = [{pipeline_mode = #tpu.pipeline_mode<synchronous>, transform_indices = @transform_0, window_bounds = array<i64: 8, 128>}, {transform_indices = @transform_1, window_bounds = array<i64: 8, 128>}]} {
    %c0 = arith.constant 0 : index
    %c0_0 = arith.constant 0 : index
    %0 = vector.load %arg1[%c0, %c0_0] : memref<8x128xf32, #tpu.memory_space<vmem>>, vector<8x128xf32>
    %c0_1 = arith.constant 0 : index
    %c0_2 = arith.constant 0 : index
    %1 = vector.load %arg2[%c0_1, %c0_2] : memref<8x128xf32, #tpu.memory_space<vmem>>, vector<8x128xf32>
    tpu.vector_store %arg2[%c0_1, %c0_2], %0 {strides = array<i32>} : memref<8x128xf32, #tpu.memory_space<vmem>>, vector<8x128xf32>,
    return
  }
  func.func @transform_0(%arg0: i32) -> (i32, i32) {
    %c0_i32 = arith.constant 0 : i32
    %c0_i32_0 = arith.constant 0 : i32
    %c0_i32_1 = arith.constant 0 : i32
    return %c0_i32, %c0_i32_0 : i32, i32
  }
  func.func @transform_1(%arg0: i32) -> (i32, i32) {
    %c0_i32 = arith.constant 0 : i32
    %c0_i32_0 = arith.constant 0 : i32
    return %arg0, %c0_i32 : i32, i32
  }
}

module attributes {stable_mosaic.version = 11 : i64} {
  func.func @_mlp_kernel_resident(%arg0: i32, %arg1: memref<16x128xf32, #tpu.memory_space<vmem>>, %arg2: memref<128x128xf32, #tpu.memory_space<vmem>>, %arg3: memref<1x128xf32, #tpu.memory_space<vmem>>, %arg4: memref<128x128xf32, #tpu.memory_space<vmem>>, %arg5: memref<1x128xf32, #tpu.memory_space<vmem>>, %arg6: memref<16x128xf32, #tpu.memory_space<vmem>>) attributes {dimension_semantics = [#tpu.dimension_semantics<parallel>], iteration_bounds = array<i64: 1>, scalar_prefetch = 0 : i64, scratch_operands = 0 : i64, tpu.core_type = #tpu.core_type<tc>, window_params = [{transform_indices = @transform_0, window_bounds = array<i64: 16, 128>}, {pipeline_mode = #tpu.pipeline_mode<synchronous>, transform_indices = @transform_1, window_bounds = array<i64: 128, 128>}, {pipeline_mode = #tpu.pipeline_mode<synchronous>, transform_indices = @transform_2, window_bounds = array<i64: 1, 128>}, {pipeline_mode = #tpu.pipeline_mode<synchronous>, transform_indices = @transform_3, window_bounds = array<i64: 128, 128>}, {pipeline_mode = #tpu.pipeline_mode<synchronous>, transform_indices = @transform_4, window_bounds = array<i64: 1, 128>}, {transform_indices = @transform_5, window_bounds = array<i64: 16, 128>}]} {
    %c0 = arith.constant 0 : index
    %c0_0 = arith.constant 0 : index
    %0 = vector.load %arg1[%c0, %c0_0] : memref<16x128xf32, #tpu.memory_space<vmem>>, vector<16x128xf32>
    %c0_1 = arith.constant 0 : index
    %c0_2 = arith.constant 0 : index
    %1 = vector.load %arg2[%c0_1, %c0_2] : memref<128x128xf32, #tpu.memory_space<vmem>>, vector<128x128xf32>
    %cst = arith.constant dense<0.000000e+00> : vector<16x128xf32>
    %2 = tpu.matmul %0, %1, %cst {dimension_numbers = #tpu.dot_dimension_numbers<[1], [0], [0], [1], [0, 0, 1, 1], [], []>} : vector<16x128xf32>, vector<128x128xf32>, vector<16x128xf32> -> vector<16x128xf32>
    %c0_3 = arith.constant 0 : index
    %c0_4 = arith.constant 0 : index
    %3 = vector.load %arg3[%c0_3, %c0_4] : memref<1x128xf32, #tpu.memory_space<vmem>>, vector<1x128xf32>
    %4 = vector.broadcast %3 : vector<1x128xf32> to vector<16x128xf32>
    %5 = arith.addf %2, %4 : vector<16x128xf32>
    %cst_5 = arith.constant 5.000000e-01 : f32
    %6 = vector.broadcast %cst_5 : f32 to vector<16x128xf32>
    %7 = arith.mulf %6, %5 : vector<16x128xf32>
    %cst_6 = arith.constant 0.707106769 : f32
    %8 = vector.broadcast %cst_6 : f32 to vector<16x128xf32>
    %9 = arith.mulf %5, %8 : vector<16x128xf32>
    %10 = math.erf %9 : vector<16x128xf32>
    %cst_7 = arith.constant 1.000000e+00 : f32
    %11 = vector.broadcast %cst_7 : f32 to vector<16x128xf32>
    %12 = arith.addf %11, %10 : vector<16x128xf32>
    %13 = arith.mulf %7, %12 : vector<16x128xf32>
    %c0_8 = arith.constant 0 : index
    %c0_9 = arith.constant 0 : index
    %14 = vector.load %arg4[%c0_8, %c0_9] : memref<128x128xf32, #tpu.memory_space<vmem>>, vector<128x128xf32>
    %cst_10 = arith.constant dense<0.000000e+00> : vector<16x128xf32>
    %15 = tpu.matmul %13, %14, %cst_10 {dimension_numbers = #tpu.dot_dimension_numbers<[1], [0], [0], [1], [0, 0, 1, 1], [], []>} : vector<16x128xf32>, vector<128x128xf32>, vector<16x128xf32> -> vector<16x128xf32>
    %c0_11 = arith.constant 0 : index
    %c0_12 = arith.constant 0 : index
    %16 = vector.load %arg5[%c0_11, %c0_12] : memref<1x128xf32, #tpu.memory_space<vmem>>, vector<1x128xf32>
    %17 = vector.broadcast %16 : vector<1x128xf32> to vector<16x128xf32>
    %18 = arith.addf %15, %17 : vector<16x128xf32>
    %c0_13 = arith.constant 0 : index
    %c0_14 = arith.constant 0 : index
    %19 = vector.load %arg6[%c0_13, %c0_14] : memref<16x128xf32, #tpu.memory_space<vmem>>, vector<16x128xf32>
    tpu.vector_store %arg6[%c0_13, %c0_14], %18 {strides = array<i32>} : memref<16x128xf32, #tpu.memory_space<vmem>>, vector<16x128xf32>,
    return
  }
  func.func @transform_0(%arg0: i32) -> (i32, i32) {
    %c0_i32 = arith.constant 0 : i32
    %c0_i32_0 = arith.constant 0 : i32
    return %arg0, %c0_i32 : i32, i32
  }
  func.func @transform_1(%arg0: i32) -> (i32, i32) {
    %c0_i32 = arith.constant 0 : i32
    %c0_i32_0 = arith.constant 0 : i32
    %c0_i32_1 = arith.constant 0 : i32
    return %c0_i32, %c0_i32_0 : i32, i32
  }
  func.func @transform_2(%arg0: i32) -> (i32, i32) {
    %c0_i32 = arith.constant 0 : i32
    %c0_i32_0 = arith.constant 0 : i32
    %c0_i32_1 = arith.constant 0 : i32
    return %c0_i32, %c0_i32_0 : i32, i32
  }
  func.func @transform_3(%arg0: i32) -> (i32, i32) {
    %c0_i32 = arith.constant 0 : i32
    %c0_i32_0 = arith.constant 0 : i32
    %c0_i32_1 = arith.constant 0 : i32
    return %c0_i32, %c0_i32_0 : i32, i32
  }
  func.func @transform_4(%arg0: i32) -> (i32, i32) {
    %c0_i32 = arith.constant 0 : i32
    %c0_i32_0 = arith.constant 0 : i32
    %c0_i32_1 = arith.constant 0 : i32
    return %c0_i32, %c0_i32_0 : i32, i32
  }
  func.func @transform_5(%arg0: i32) -> (i32, i32) {
    %c0_i32 = arith.constant 0 : i32
    %c0_i32_0 = arith.constant 0 : i32
    return %arg0, %c0_i32 : i32, i32
  }
}

</mosaic_0001>

<bundles_post_ra>
// kernel: tpu_custom_call.1
= control target key start
LH: loop header
LB: loop body
LE: loop exit
PB: predicated region body
PF: predicated region fallthrough
CT: control target
= control target key end

     0   :  { %6 = vsyncpa [#allocation3], 0  ;;  %s440_s0 = inlined_call_operand.hbm [shape: f32[16,128], index: 0, kind: input, shape index: {}]   ;;  %s441_s1 = inlined_call_operand.hbm [shape: f32[16,128], index: 1, kind: output, shape index: {}]  }
   0x1   :  { %7 = vsyncpa [#allocation4], 0 }
   0x2   :  { %9 = vsyncpa [#allocation4 + $0x1], 0  ;;  %s356_s6 = smov 0   ;;  %s358_s7 = smov 0  }
   0x3   :  { %s360_s8 = smov 0   ;;  %s362_s9 = smov 0  }
   0x4 LB: > { %s377_s10 = sadd.s32 4294967295, %s343_s9   ;;  %s187_s11 = sadd.s32 4294967294, %s343_s9   ;;  %s343_s9 = sphi %s362_s9, %s447_s9   ;;  %s339_s8 = sphi %s360_s8, %s446_s8   ;;  %s335_s7 = sphi %s358_s7, %s445_s7   ;;  %s331_s6 = sphi %s356_s6, %s444_s6  }
   0x5   : > { %s381_s12 = sadd.s32 1, %s343_s9   ;;  %s43_s13 = sadd.s32 1, %s339_s8 }
   0x6   : > { %s40_s14 = ssub.s32 %s343_s9, %s381_s12  ;;  %p53_p0 = scmp.ne.s32.totalorder %s339_s8, %s335_s7 }
   0x7   : > { %p41_p1 = scmp.eq.s32.totalorder %s40_s14, 0  ;;  %p54_p2 = scmp.eq.s32.totalorder %s377_s10, 1 }
   0x8   : > { %p59_p3 = scmp.ne.s32.totalorder %s335_s7, %s331_s6  ;;  %p60_p4 = scmp.eq.s32.totalorder %s187_s11, 1 }
   0x9   : > { %s392_s15 = scalar_select %p41_p1, %s339_s8, %s43_s13  }
   0xa   : > { %p394_p5 = por %p54_p2, %p53_p0  ;;  %p398_p6 = por %p60_p4, %p59_p3 }
   0xb   : > { %p188_p7 = scmp.ge.s32.totalorder %s343_s9, 1  ;;  %p67_p8 = scmp.lt.s32.totalorder %s343_s9, 3 }
   0xc   : > { %p211_p9 = scmp.eq.s32.totalorder %s377_s10, 0  ;;  %s79_s20 = sshll.u32 %s440_s0, 4  ;;  %s80_s20 = int_to_ptr.hbm [resolvable:$true] %s79_s20 }
   0xd   : > { %p68_p10 = pnand %p188_p7, %p67_p8  ;;  %s345_s21 = smov [#allocation2]  }
   0xe   : > { %s81_s22 = sshll.u32 %s345_s21, 4  ;;  %s82_s22 = int_to_ptr.vmem [resolvable:$true] %s81_s22 }
   0xf   : > { %p203_p11 = pneg %p68_p10  ;;  %94 = sbr.rel (%p68_p10) target bundleno = 37 (0x25), region = 24 }
  0x11   : > { %p204_p12 = pnand %p211_p9, %p203_p11 }
  0x13   : > { %206 = dma.hbm_to_vmem [thread:$0]  (!%p204_p12), %s80_s20, 128, %s82_s22, [#allocation3]  }
  0x14   : > { %322 = dma.done.wait (%p211_p9), [#allocation3], 128  }
  0x15   : > { %324 = vsyncadd (%p211_p9), [#allocation3], 4294967168  ;;  %s107_s23 = sand.u32 1, %s335_s7   ;;  %s194_s24 = sshll.u32 %s377_s10, 3  ;;  %v110_v0 = vld [vmem:[#allocation2] sm:$0xff] }
  0x16   : > { %s192_s25 = sshll.u32 %s107_s23, 3  ;;  %s123_s28 = scalar_lea.hbm %s441_s1, %s194_s24 }
  0x17   : > { %s109_s29 = scalar_lea.vmem [#allocation5], %s192_s25  ;;  %s127_s2 = sshll.u32 %s123_s28, 4  ;;  %s128_s2 = int_to_ptr.hbm [resolvable:$true] %s127_s2 }
  0x18   : > { %s125_s30 = sshll.u32 %s109_s29, 4  ;;  %111 = vst [vmem:[%s109_s29] sm:$0xff] %v110_v0  ;;  %s113_s3 = scalar_lea.sflag [#allocation4], %s107_s23  ;;  %s126_s30 = int_to_ptr.vmem [resolvable:$true] %s125_s30 }
  0x19   : > { %s291_s4 = sshra.s32 %s128_s2, 4  ;;  %s297_s13 = scalar_lea.hbm %s441_s1, 16  ;;  %s292_s4 = int_to_ptr.hbm [resolvable:$true] %s291_s4 }
  0x1a   : > { %s293_s5 = scalar_lea.hbm %s292_s4, 8  ;;  %p298_p2 = scmp.lt.s32.totalorder %s292_s4, %s441_s1 }
  0x1b   : > { %p294_p13 = scmp.ne.s32.totalorder %s292_s4, %s293_s5  ;;  %p299_p3 = scmp.lt.s32.totalorder %s297_s13, %s293_s5 }
  0x1d   : > { %p295_p0 = pnand %p294_p13, %p394_p5  ;;  %p300_p4 = por %p299_p3, %p298_p2 }
  0x1f   : > { %p296_p1 = pneg %p295_p0 }
  0x21   : > { %p301_p7 = pnand %p300_p4, %p296_p1 }
  0x23   : > { %304 = shalt.err (!%p301_p7)
}
  0x24   : > { %201 = dma.vmem_to_hbm [thread:$0]  (%p394_p5), %s126_s30, 128, %s128_s2, %s113_s3  }
  0x25 PF: > { %p213_p8 = scmp.ge.s32.totalorder %s343_s9, 2  ;;  %s139_s19 = sand.u32 1, %s331_s6  }
  0x26   : > { %s140_s20 = scalar_lea.sflag [#allocation4], %s139_s19 }
  0x27   : > { %p208_p9 = pnand %p213_p8, %p398_p6 }
  0x29   : > { %p209_p10 = pneg %p208_p9 }
  0x2b   : > { %326 = dma.done.wait (%p209_p10), %s140_s20, 128  }
  0x2c   : > { %328 = vsyncadd (%p209_p10), %s140_s20, 4294967168  ;;  %p12_p11 = scmp.ge.s32.totalorder %s381_s12, 4   ;;  %s444_s6 = smov %s335_s7 }
  0x2d   : > { %s445_s7 = smov %s339_s8  ;;  %s446_s8 = smov %s392_s15 }
  0x2e   : > { %s447_s9 = smov %s381_s12  ;;  %14 = sbr.rel (!%p12_p11) target bundleno = 4 (0x4), region = 61 }
  0x33   :  { %146 = vsyncpa [#allocation3], 1 }
  0x34   :  { %148 = vsyncpa [#allocation3 + $0x1], 1 }
  0x35   :  { %149 = vsyncpa [#allocation4], 1 }
  0x36   :  { %151 = vsyncpa [#allocation4 + $0x1], 1 }

// kernel: tpu_custom_call.1
= control target key start
LH: loop header
LB: loop body
LE: loop exit
PB: predicated region body
PF: predicated region fallthrough
CT: control target
= control target key end

     0   :  { %10 = vsyncpa [#allocation3], 0  ;;  %s510_s0 = inlined_call_operand.hbm [shape: f32[16,128], index: 0, kind: input, shape index: {}]   ;;  %s511_s1 = inlined_call_operand.hbm [shape: f32[128,128], index: 1, kind: input, shape index: {}]   ;;  %s512_s2 = inlined_call_operand.vmem [shape: f32[1,128], index: 2, kind: input, shape index: {}]   ;;  %s513_s3 = inlined_call_operand.hbm [shape: f32[128,128], index: 3, kind: input, shape index: {}]   ;;  %s514_s4 = inlined_call_operand.vmem [shape: f32[1,128], index: 4, kind: input, shape index: {}]   ;;  %s515_s5 = inlined_call_operand.hbm [shape: f32[16,128], index: 5, kind: output, shape index: {}]  }
   0x1   :  { %11 = vsyncpa [#allocation6], 0 }
   0x2   :  { %12 = vsyncpa [#allocation4], 0  ;;  %s30_s20 = sshll.u32 %s511_s1, 4  ;;  %s414_s21 = smov [#allocation5]   ;;  %s31_s20 = int_to_ptr.hbm [resolvable:$true] %s30_s20 }
   0x3   :  { %s32_s22 = sshll.u32 %s414_s21, 4  ;;  %s17_s25 = sshll.u32 %s510_s0, 4  ;;  %s33_s22 = int_to_ptr.vmem [resolvable:$true] %s32_s22  ;;  %s18_s25 = int_to_ptr.hbm [resolvable:$true] %s17_s25 }
   0x4   :  { %s415_s26 = smov 128   ;;  %s416_s27 = smov 8  }
   0x5   :  { %38 = dma.hbm_to_vmem [thread:$0]  %s31_s20, 2048, %s33_s22, [#allocation6], %s415_s26, %s415_s26, %s416_s27  }
   0x6   :  { %s417_s28 = smov [#allocation2]   ;;  %s45_s1 = sshll.u32 %s513_s3, 4  ;;  %s46_s1 = int_to_ptr.hbm [resolvable:$true] %s45_s1 }
   0x7   :  { %s19_s29 = sshll.u32 %s417_s28, 4  ;;  %s418_s0 = smov [#allocation7]   ;;  %s20_s29 = int_to_ptr.vmem [resolvable:$true] %s19_s29 }
   0x8   :  { %25 = dma.hbm_to_vmem [thread:$0]  %s18_s25, 256, %s20_s29, [#allocation3], %s415_s26, %s415_s26, %s416_s27  }
   0x9   :  { %s47_s7 = sshll.u32 %s418_s0, 4  ;;  %s48_s7 = int_to_ptr.vmem [resolvable:$true] %s47_s7 }
   0xa   :  { %53 = dma.hbm_to_vmem [thread:$0]  %s46_s1, 2048, %s48_s7, [#allocation6], %s415_s26, %s415_s26, %s416_s27  }
   0xb   :  { %408 = dma.done.wait [#allocation3], 256  }
   0xc   :  { %409 = vsyncadd [#allocation3], 4294967040 }
   0xd   :  { %410 = dma.done.wait [#allocation6], 4096  }
   0xe   :  { %411 = vsyncadd [#allocation6], 4294963200  ;;  %v85_v0 = vld [vmem:[#allocation5 + $0x78] sm:$0xff]  ;;  %v84_v1 = vld [vmem:[#allocation5 + $0x70] sm:$0xff]  ;;  %s419_s10 = smov [#allocation8]   ;;  %s252_s14 = sshll.u32 %s515_s5, 4  ;;  %s253_s14 = int_to_ptr.hbm [resolvable:$true] %s252_s14 }
   0xf   :  { %90 = vmatpush.msra.mxu0 %v85_v0  ;;  %268 = vmatpush.msra.mxu2 %v85_v0  ;;  %v83_v2 = vld [vmem:[#allocation5 + $0x68] sm:$0xff]  ;;  %v82_v3 = vld [vmem:[#allocation5 + $0x60] sm:$0xff]  ;;  %v81_v4 = vld [vmem:[#allocation5 + $0x58] sm:$0xff]  ;;  %s250_s11 = sshll.u32 %s419_s10, 4  ;;  %s251_s11 = int_to_ptr.vmem [resolvable:$true] %s250_s11 }
  0x10   :  { %v80_v5 = vld [vmem:[#allocation5 + $0x50] sm:$0xff]  ;;  %v79_v6 = vld [vmem:[#allocation5 + $0x48] sm:$0xff]  ;;  %v78_v7 = vld [vmem:[#allocation5 + $0x40] sm:$0xff] }
  0x11   :  { %91 = vmatpush.msra.mxu0 %v84_v1  ;;  %269 = vmatpush.msra.mxu2 %v84_v1  ;;  %v77_v8 = vld [vmem:[#allocation5 + $0x38] sm:$0xff]  ;;  %v76_v9 = vld [vmem:[#allocation5 + $0x30] sm:$0xff]  ;;  %v75_v10 = vld [vmem:[#allocation5 + $0x28] sm:$0xff] }
  0x12   :  { %v74_v11 = vld [vmem:[#allocation5 + $0x20] sm:$0xff]  ;;  %v73_v12 = vld [vmem:[#allocation5 + $0x18] sm:$0xff]  ;;  %v72_v13 = vld [vmem:[#allocation5 + $0x10] sm:$0xff] }
  0x13   :  { %92 = vmatpush.msra.mxu0 %v83_v2  ;;  %270 = vmatpush.msra.mxu2 %v83_v2  ;;  %v71_v14 = vld [vmem:[#allocation5 + $0x8] sm:$0xff]  ;;  %v70_v15 = vld [vmem:[#allocation5] sm:$0xff]  ;;  %v68_v16 = vld [vmem:[#allocation2] sm:$0xff] }
  0x14   :  { %v69_v17 = vld [vmem:[#allocation2 + $0x8] sm:$0xff]  ;;  %v215_v19 = vld [vmem:[#allocation7 + $0x70] sm:$0xff]  ;;  %v214_v20 = vld [vmem:[#allocation7 + $0x68] sm:$0xff] }
  0x15   :  { %93 = vmatpush.msra.mxu0 %v82_v3  ;;  %271 = vmatpush.msra.mxu2 %v82_v3  ;;  %v216_v18 = vld [vmem:[#allocation7 + $0x78] sm:$0xff]  ;;  %v213_v21 = vld [vmem:[#allocation7 + $0x60] sm:$0xff]  ;;  %v306_v22 = vld [vmem:[%s512_s2] ss:$0 sm:$0xff] }
  0x16   :  { %221 = vmatpush.msra.mxu1 %v216_v18  ;;  %284 = vmatpush.msra.mxu3 %v216_v18  ;;  %v212_v23 = vld [vmem:[#allocation7 + $0x58] sm:$0xff]  ;;  %v211_v25 = vld [vmem:[#allocation7 + $0x50] sm:$0xff]  ;;  %v210_v27 = vld [vmem:[#allocation7 + $0x48] sm:$0xff] }
  0x17   :  { %94 = vmatpush.msra.mxu0 %v81_v4  ;;  %272 = vmatpush.msra.mxu2 %v81_v4  ;;  %v209_v29 = vld [vmem:[#allocation7 + $0x40] sm:$0xff]  ;;  %v208_v30 = vld [vmem:[#allocation7 + $0x38] sm:$0xff]  ;;  %v207_v33 = vld [vmem:[#allocation7 + $0x30] sm:$0xff] }
  0x18   :  { %222 = vmatpush.msra.mxu1 %v215_v19  ;;  %285 = vmatpush.msra.mxu3 %v215_v19  ;;  %v206_v36 = vld [vmem:[#allocation7 + $0x28] sm:$0xff]  ;;  %v205_v39 = vld [vmem:[#allocation7 + $0x20] sm:$0xff]  ;;  %v204_v43 = vld [vmem:[#allocation7 + $0x18] sm:$0xff] }
  0x19   :  { %95 = vmatpush.msra.mxu0 %v80_v5  ;;  %273 = vmatpush.msra.mxu2 %v80_v5  ;;  %v203_v47 = vld [vmem:[#allocation7 + $0x10] sm:$0xff]  ;;  %v202_v52 = vld [vmem:[#allocation7 + $0x8] sm:$0xff]  ;;  %v201_v56 = vld [vmem:[#allocation7] sm:$0xff] }
  0x1a   :  { %223 = vmatpush.msra.mxu1 %v214_v20  ;;  %286 = vmatpush.msra.mxu3 %v214_v20 }
  0x1b   :  { %96 = vmatpush.msra.mxu0 %v79_v6  ;;  %274 = vmatpush.msra.mxu2 %v79_v6 }
  0x1c   :  { %224 = vmatpush.msra.mxu1 %v213_v21  ;;  %287 = vmatpush.msra.mxu3 %v213_v21 }
  0x1d   :  { %97 = vmatpush.msra.mxu0 %v78_v7  ;;  %275 = vmatpush.msra.mxu2 %v78_v7 }
  0x1e   :  { %225 = vmatpush.msra.mxu1 %v212_v23  ;;  %288 = vmatpush.msra.mxu3 %v212_v23 }
  0x1f   :  { %98 = vmatpush.msra.mxu0 %v77_v8  ;;  %276 = vmatpush.msra.mxu2 %v77_v8 }
  0x20   :  { %226 = vmatpush.msra.mxu1 %v211_v25  ;;  %289 = vmatpush.msra.mxu3 %v211_v25 }
  0x21   :  { %99 = vmatpush.msra.mxu0 %v76_v9  ;;  %277 = vmatpush.msra.mxu2 %v76_v9 }
  0x22   :  { %227 = vmatpush.msra.mxu1 %v210_v27  ;;  %290 = vmatpush.msra.mxu3 %v210_v27 }
  0x23   :  { %100 = vmatpush.msra.mxu0 %v75_v10  ;;  %278 = vmatpush.msra.mxu2 %v75_v10 }
  0x24   :  { %228 = vmatpush.msra.mxu1 %v209_v29  ;;  %291 = vmatpush.msra.mxu3 %v209_v29 }
  0x25   :  { %101 = vmatpush.msra.mxu0 %v74_v11  ;;  %279 = vmatpush.msra.mxu2 %v74_v11 }
  0x26   :  { %229 = vmatpush.msra.mxu1 %v208_v30  ;;  %292 = vmatpush.msra.mxu3 %v208_v30 }
  0x27   :  { %102 = vmatpush.msra.mxu0 %v73_v12  ;;  %280 = vmatpush.msra.mxu2 %v73_v12 }
  0x28   :  { %230 = vmatpush.msra.mxu1 %v207_v33  ;;  %293 = vmatpush.msra.mxu3 %v207_v33 }
  0x29   :  { %103 = vmatpush.msra.mxu0 %v72_v13  ;;  %281 = vmatpush.msra.mxu2 %v72_v13 }
  0x2a   :  { %231 = vmatpush.msra.mxu1 %v206_v36  ;;  %294 = vmatpush.msra.mxu3 %v206_v36 }
  0x2b   :  { %104 = vmatpush.msra.mxu0 %v71_v14  ;;  %282 = vmatpush.msra.mxu2 %v71_v14 }
  0x2c   :  { %232 = vmatpush.msra.mxu1 %v205_v39  ;;  %295 = vmatpush.msra.mxu3 %v205_v39 }
  0x2d   :  { %105 = vmatpush.msra.mxu0 %v70_v15  ;;  %283 = vmatpush.msra.mxu2 %v70_v15 }
  0x2e   :  { %106 = vmatmul.f32.vlgmr.msra.gmra.mxu0 %v68_v16  ;;  %109 = vmatmul.f32.vlgmr.msra.gmra.mxu2 %v69_v17 }
  0x2f   :  { %233 = vmatpush.msra.mxu1 %v204_v43  ;;  %296 = vmatpush.msra.mxu3 %v204_v43 }
  0x31   :  { %234 = vmatpush.msra.mxu1 %v203_v47  ;;  %297 = vmatpush.msra.mxu3 %v203_v47 }
  0x33   :  { %235 = vmatpush.msra.mxu1 %v202_v52  ;;  %298 = vmatpush.msra.mxu3 %v202_v52 }
  0x35   :  { %236 = vmatpush.msra.mxu1 %v201_v56  ;;  %299 = vmatpush.msra.mxu3 %v201_v56  ;;  %v307_v56 = vld [vmem:[%s514_s4] ss:$0 sm:$0xff] }
  0xab   :  { %v107_v24 = vpop.f32.mrf.mxu0 }
  0xac   :  { %v471_v26 = vadd.f32 %v306_v22, %v107_v24 }
  0xae   :  { %v474_v28 = vmul.f32 0.70710677, %v471_v26  ;;  %v113_v47 = vmul.f32 0.5, %v471_v26 }
  0xb0   :  { %v117_v31 = vmul.f32 %v474_v28, %v474_v28 }
  0xb1   :  { %v110_v32 = vpop.f32.mrf.mxu2 }
  0xb2   :  { %v478_v34 = vmin.f32 %v117_v31, 16.0  ;;  %v480_v35 = vadd.f32 %v306_v22, %v110_v32 }
  0xb4   :  { %v119_v37 = vmul.f32 2.1237322e-06, %v478_v34  ;;  %v484_v38 = vmul.f32 0.70710677, %v480_v35  ;;  %v130_v40 = vmul.f32 3.8918573e-05, %v478_v34 }
  0xb6   :  { %v120_v41 = vadd.f32 0.00028619796, %v119_v37  ;;  %v157_v42 = vmul.f32 %v484_v38, %v484_v38  ;;  %v131_v44 = vadd.f32 0.001143296, %v130_v40 }
  0xb8   :  { %v121_v45 = vmul.f32 %v120_v41, %v478_v34  ;;  %v158_v46 = vmin.f32 %v157_v42, 16.0  ;;  %v132_v48 = vmul.f32 %v131_v44, %v478_v34 }
  0xba   :  { %v159_v49 = vmul.f32 2.1237322e-06, %v158_v46  ;;  %v170_v50 = vmul.f32 3.8918573e-05, %v158_v46  ;;  %v122_v51 = vadd.f32 0.0036580483, %v121_v45 }
  0xbb   :  { %v133_v53 = vadd.f32 0.014752088, %v132_v48 }
  0xbc   :  { %v160_v54 = vadd.f32 0.00028619796, %v159_v49  ;;  %v171_v55 = vadd.f32 0.001143296, %v170_v50  ;;  %v123_v60 = vmul.f32 %v122_v51, %v478_v34 }
  0xbd   :  { %v134_v57 = vmul.f32 %v133_v53, %v478_v34  ;;  %v114_v53 = vmul.f32 0.5, %v480_v35 }
  0xbe   :  { %v161_v58 = vmul.f32 %v160_v54, %v158_v46  ;;  %v172_v59 = vmul.f32 %v171_v55, %v158_v46  ;;  %v124_v2 = vadd.f32 0.05243302, %v123_v60 }
  0xbf   :  { %v135_v61 = vadd.f32 0.112945676, %v134_v57 }
  0xc0   :  { %v162_v62 = vadd.f32 0.0036580483, %v161_v58  ;;  %v173_v63 = vadd.f32 0.014752088, %v172_v59  ;;  %v125_v8 = vmul.f32 %v124_v2, %v478_v34 }
  0xc1   :  { %v136_v0 = vmul.f32 %v135_v61, %v478_v34 }
  0xc2   :  { %v174_v1 = vmul.f32 %v173_v63, %v158_v46  ;;  %v163_v4 = vmul.f32 %v162_v62, %v158_v46  ;;  %v126_v13 = vadd.f32 0.18741608, %v125_v8 }
  0xc3   :  { %v137_v3 = vadd.f32 0.4994258, %v136_v0 }
  0xc4   :  { %v175_v5 = vadd.f32 0.112945676, %v174_v1  ;;  %v164_v10 = vadd.f32 0.05243302, %v163_v4  ;;  %v127_v17 = vmul.f32 %v126_v13, %v478_v34 }
  0xc5   :  { %v138_v6 = vmul.f32 %v137_v3, %v478_v34 }
  0xc6   :  { %v176_v7 = vmul.f32 %v175_v5, %v158_v46  ;;  %v165_v14 = vmul.f32 %v164_v10, %v158_v46  ;;  %v128_v21 = vadd.f32 1.1283791, %v127_v17 }
  0xc7   :  { %v139_v9 = vadd.f32 1.0, %v138_v6 }
  0xc8   :  { %v177_v11 = vadd.f32 0.4994258, %v176_v7  ;;  %v166_v18 = vadd.f32 0.18741608, %v165_v14  ;;  %v129_v31 = vmul.f32 %v128_v21, %v474_v28 }
  0xc9   :  { %308 = vrcp.f32 %v139_v9  ;;  %v151_v22 = vand.u32 2147483648, %v139_v9  ;;  %v149_v27 = vand.u32 2147483647, %v139_v9  ;;  %vm145_vm1 = vweird.f32 %v139_v9 }
  0xca   :  { %v178_v12 = vmul.f32 %v177_v11, %v158_v46  ;;  %v167_v24 = vmul.f32 %v166_v18, %v158_v46 }
  0xcb   :  { %v152_v32 = vor.u32 1.1754944e-38, %v151_v22  ;;  %vm150_vm3 = vcmp.eq.f32.partialorder %v149_v27, 8.507059e+37 }
  0xcc   :  { %v179_v15 = vadd.f32 1.0, %v178_v12  ;;  %v168_v36 = vadd.f32 1.1283791, %v167_v24 }
  0xce   :  { %310 = vrcp.f32 %v179_v15  ;;  %v191_v37 = vand.u32 2147483648, %v179_v15  ;;  %v189_v41 = vand.u32 2147483647, %v179_v15  ;;  %vm185_vm5 = vweird.f32 %v179_v15 }
  0xcf   :  { %v309_v16 = vpop.eup %308  ;;  %v169_v46 = vmul.f32 %v168_v36, %v484_v38 }
  0xd0   :  { %v141_v19 = vmul.f32 %v309_v16, %v139_v9  ;;  %vm146_vm0 = vweird.f32 %v309_v16  ;;  %v192_v45 = vor.u32 1.1754944e-38, %v191_v37  ;;  %vm190_vm7 = vcmp.eq.f32.partialorder %v189_v41, 8.507059e+37 }
  0xd1   :  { %vm147_vm2 = vmor %vm145_vm1, %vm146_vm0 }
  0xd2   :  { %v142_v20 = vsub.f32 1.0, %v141_v19 }
  0xd4   :  { %v311_v23 = vpop.eup %310  ;;  %v143_v25 = vmul.f32 %v309_v16, %v142_v20 }
  0xd5   :  { %v181_v29 = vmul.f32 %v311_v23, %v179_v15  ;;  %vm186_vm4 = vweird.f32 %v311_v23 }
  0xd6   :  { %v144_v30 = vadd.f32 %v309_v16, %v143_v25  ;;  %vm187_vm6 = vmor %vm185_vm5, %vm186_vm4 }
  0xd7   :  { %v182_v33 = vsub.f32 1.0, %v181_v29 }
  0xd8   :  { %v148_v34 = vsel %vm147_vm2, %v309_v16, %v144_v30 }
  0xd9   :  { %v153_v39 = vsel %vm150_vm3, %v152_v32, %v148_v34  ;;  %v183_v40 = vmul.f32 %v311_v23, %v182_v33 }
  0xda   :  { %v154_v42 = vmul.f32 %v153_v39, %v129_v31 }
  0xdb   :  { %v184_v43 = vadd.f32 %v311_v23, %v183_v40 }
  0xdc   :  { %v266_v44 = vclamps-f32 %v154_v42, 1.0 }
  0xdd   :  { %v188_v28 = vsel %vm187_vm6, %v311_v23, %v184_v43 }
  0xde   :  { %v197_v48 = vadd.f32 1.0, %v266_v44  ;;  %v193_v49 = vsel %vm190_vm7, %v192_v45, %v188_v28 }
  0xdf   :  { %v194_v50 = vmul.f32 %v193_v49, %v169_v46 }
  0xe0   :  { %v199_v51 = vmul.f32 %v197_v48, %v113_v47 }
  0xe1   :  { %v267_v52 = vclamps-f32 %v194_v50, 1.0 }
  0xe2   :  { %237 = vmatmul.f32.vlgmr.msra.gmra.mxu1 %v199_v51 }
  0xe3   :  { %v198_v54 = vadd.f32 1.0, %v267_v52 }
  0xe5   :  { %v200_v55 = vmul.f32 %v198_v54, %v114_v53 }
  0xe7   :  { %240 = vmatmul.f32.vlgmr.msra.gmra.mxu3 %v200_v55 }
 0x15f   :  { %v238_v38 = vpop.f32.mrf.mxu1 }
 0x160   :  { %v239_v57 = vadd.f32 %v307_v56, %v238_v38 }
 0x162   :  { %244 = vst [vmem:[#allocation8] sm:$0xff] %v239_v57 }
 0x16a   :  { %v241_v26 = vpop.f32.mrf.mxu3 }
 0x16b   :  { %v242_v58 = vadd.f32 %v307_v56, %v241_v26 }
 0x16d   :  { %245 = vst [vmem:[#allocation8 + $0x8] sm:$0xff] %v242_v58 }
 0x16e   :  { %258 = dma.vmem_to_hbm [thread:$0]  %s251_s11, 256, %s253_s14, [#allocation4], %s415_s26, %s415_s26, %s416_s27  }
 0x16f   :  { %412 = dma.done.wait [#allocation4], 256  }
 0x170   :  { %413 = vsyncadd [#allocation4], 4294967040 }
 0x171   :  { %263 = vsyncpa [#allocation3], 1 }
 0x172   :  { %264 = vsyncpa [#allocation6], 1 }
 0x173   :  { %265 = vsyncpa [#allocation4], 1 }

</bundles_post_ra>
